<compile_context>
chip_gen: v7x
topology: tpu7x:2x2x1
jax: 0.10.0
libtpu: 0.0.40
codegen_flags: <defaults>
</compile_context>

<pallas_src>
import functools

import jax
import jax.numpy as jnp
from jax.experimental import pallas as pl
from jax.experimental.pallas import tpu as pltpu


def _gather_rows(idx_ref, w1_ref, h_buf, base, nrows):
    """h_buf[b, :] = w1_ref[idx_ref[base + b], :] for b in [0, nrows).

    The one-hot first Linear is exactly a row gather of W1; with W1 resident in
    VMEM this is just `nrows` dynamic (1, E) vector loads/stores.
    """

    @pl.loop(0, nrows)
    def _(b):
        row = idx_ref[base + b]
        h_buf[pl.ds(b, 1), :] = w1_ref[pl.ds(row, 1), :]


def _cbow_small_kernel(idx_ref, w1_ref, w2_ref, b2_ref, o_ref, h_buf):
    """Single-invocation path: gather + one (B, E) @ (E, V) matmul."""
    _gather_rows(idx_ref, w1_ref, h_buf, 0, h_buf.shape[0])
    h = h_buf[...].astype(w2_ref.dtype)                    # f32 -> bf16
    o_ref[...] = (
        jnp.dot(h, w2_ref[...], preferred_element_type=jnp.float32)
        + b2_ref[...]
    )


def _cbow_tiled_kernel(idx_ref, w1_ref, w2_ref, b2_ref, o_ref, h_buf,
                       *, block_b):
    """Batch x vocab tiled path.  idx_ref is the scalar-prefetched index array."""
    i = pl.program_id(0)   # batch block
    j = pl.program_id(1)   # vocab tile

    # Vocab axis is "arbitrary" (sequential per core), so j == 0 is the first
    # visit of each batch block on a core: gather the hidden rows once and
    # reuse them across all vocab tiles.
    @pl.when(j == 0)
    def _():
        _gather_rows(idx_ref, w1_ref, h_buf, i * block_b, block_b)

    h = h_buf[...].astype(w2_ref.dtype)
    o_ref[...] = (
        jnp.dot(h, w2_ref[...], preferred_element_type=jnp.float32)
        + b2_ref[...]
    )


def cbow_prepare_params(w1, b1, w2, b2, *, w2_dtype=jnp.bfloat16):
    """Host-side prep: fold b1 into the output bias (f32) and quantize W2.

    w1: (V, E) f32, b1: (1, E) f32, w2: (E, V) f32, b2: (1, V) f32
    Returns (w1_f32, w2_q, b2_fused_f32) for `cbow_forward`.
    """
    b2_fused = (b1.astype(jnp.float32) @ w2.astype(jnp.float32)
                + b2.astype(jnp.float32))
    return w1.astype(jnp.float32), w2.astype(w2_dtype), b2_fused


def _cbow_forward_small(indices, w1, w2, b2):
    B = indices.shape[0]
    V, E = w1.shape
    return pl.pallas_call(
        _cbow_small_kernel,
        out_shape=jax.ShapeDtypeStruct((B, V), jnp.float32),
        in_specs=[
            pl.BlockSpec(memory_space=pltpu.MemorySpace.SMEM),   # indices
            pl.BlockSpec(memory_space=pltpu.MemorySpace.VMEM),   # w1
            pl.BlockSpec(memory_space=pltpu.MemorySpace.VMEM),   # w2
            pl.BlockSpec(memory_space=pltpu.MemorySpace.VMEM),   # b2 (fused)
        ],
        out_specs=pl.BlockSpec(memory_space=pltpu.MemorySpace.VMEM),
        scratch_shapes=[pltpu.VMEM((B, E), jnp.float32)],
    )(indices, w1, w2, b2)


def _cbow_forward_tiled(indices, w1, w2, b2, *, block_b, vocab_tile):
    B = indices.shape[0]
    V, E = w1.shape
    assert B % block_b == 0, "pad the batch to a multiple of block_b"
    assert V % vocab_tile == 0, "pad the vocab to a multiple of vocab_tile"
    assert vocab_tile % 128 == 0, "keep output stores lane-dense"
    # This path keeps W1 resident in VMEM; see TODO(synk) at the top for the
    # HBM-gather variant needed once W1 itself outgrows VMEM.
    assert V * E * 4 <= 16 * 1024 * 1024, "W1 must fit VMEM for this path"

    nb = B // block_b
    nv = V // vocab_tile
    kernel = functools.partial(_cbow_tiled_kernel, block_b=block_b)
    return pl.pallas_call(
        kernel,
        out_shape=jax.ShapeDtypeStruct((B, V), jnp.float32),
        grid_spec=pltpu.PrefetchScalarGridSpec(
            num_scalar_prefetch=1,          # indices -> SMEM, visible everywhere
            grid=(nb, nv),
            in_specs=[
                pl.BlockSpec((V, E), lambda i, j, idx: (0, 0)),            # w1
                pl.BlockSpec((E, vocab_tile), lambda i, j, idx: (0, j)),   # w2
                pl.BlockSpec((1, vocab_tile), lambda i, j, idx: (0, j)),   # b2
            ],
            out_specs=pl.BlockSpec((block_b, vocab_tile),
                                   lambda i, j, idx: (i, j)),
            scratch_shapes=[pltpu.VMEM((block_b, E), jnp.float32)],
        ),
        compiler_params=pltpu.CompilerParams(
            dimension_semantics=("parallel", "arbitrary"),
        ),
    )(indices, w1, w2, b2)


def cbow_forward(indices, w1, w2, b2, *, block_b=None, vocab_tile=None,
                 force_tiled=False):
    """CBOW forward for one-hot inputs given as integer indices.

    indices: (B,) int32 -- position of the 1 in each one-hot input row
             (must be in [0, V); there is no runtime bounds check).
    w1: (V, E) f32            -- hidden layer weight, stored (in, out).
    w2: (E, V) bf16 (or f32)  -- output layer weight, stored (in, out).
    b2: (1, V) f32            -- fused bias: b1 @ w2 + b2 (see prepare_params).
    Returns (B, V) float32.
    """
    B = indices.shape[0]
    V, E = w1.shape
    assert w2.shape == (E, V) and b2.shape == (1, V)
    assert indices.dtype == jnp.int32

    # Rough resident-VMEM footprint of the single-invocation path.  At toy
    # sizes this is a few hundred KiB -- far under the scoped-VMEM default on
    # every generation (v5e 16 MiB, v6e/v7x 32 MiB), so one grid=() call beats
    # any pipelined grid (no per-step setup / priming overhead).
    small_bytes = (w1.size * w1.dtype.itemsize
                   + w2.size * w2.dtype.itemsize
                   + b2.size * 4
                   + B * E * 4          # gathered hidden scratch
                   + B * V * 4)         # output block
    if not force_tiled and small_bytes <= 8 * 1024 * 1024:
        return _cbow_forward_small(indices, w1, w2, b2)

    # Tiled path: pick MXU-friendly defaults (M=256 fills the v6e/v7x MXU,
    # vocab tiles of >=128 keep output stores unmasked / lane-dense).
    block_b = block_b if block_b is not None else min(B, 256)
    vocab_tile = vocab_tile if vocab_tile is not None else min(V, 512)
    return _cbow_forward_tiled(indices, w1, w2, b2,
                               block_b=block_b, vocab_tile=vocab_tile)


if __name__ == "__main__":
    batch_size = 8
    one_hot_length = 256   # == voc_size (one-hot encoded vocabulary)
    embedding_length = 128

    key = jax.random.PRNGKey(0)
    kx, k1, kb1, k2, kb2, kx2 = jax.random.split(key, 6)

    # Context-word indices (the "1" position of each one-hot input row).
    idx = jax.random.randint(kx, (batch_size,), 0, one_hot_length,
                             dtype=jnp.int32)

    # PyTorch Linear-style uniform init; weights stored pre-transposed (in, out).
    bound1 = 1.0 / (one_hot_length ** 0.5)
    w1 = jax.random.uniform(k1, (one_hot_length, embedding_length),
                            jnp.float32, -bound1, bound1)
    b1 = jax.random.uniform(kb1, (1, embedding_length),
                            jnp.float32, -bound1, bound1)

    bound2 = 1.0 / (embedding_length ** 0.5)
    w2 = jax.random.uniform(k2, (embedding_length, one_hot_length),
                            jnp.float32, -bound2, bound2)
    b2 = jax.random.uniform(kb2, (1, one_hot_length),
                            jnp.float32, -bound2, bound2)

    # Fold b1 into the output bias (f32) and quantize W2 to bf16.
    w1_p, w2_p, b2_p = cbow_prepare_params(w1, b1, w2, b2)

    def reference_quantized(indices):
        # Same arithmetic as the kernel: row gather, bf16 matmul, f32 acc,
        # f32 fused bias.
        h = w1[indices].astype(jnp.bfloat16)
        return jnp.dot(h, w2_p, preferred_element_type=jnp.float32) + b2_p

    def reference_f32(indices):
        # Exact equivalent of (one_hot(indices) @ w1 + b1) @ w2 + b2 in f32.
        return (w1[indices] + b1) @ w2 + b2

    # --- small-batch, single-invocation path (grid=()) ---
    out = jax.block_until_ready(cbow_forward(idx, w1_p, w2_p, b2_p))
    assert out.shape == (batch_size, one_hot_length)
    assert jnp.allclose(out, reference_quantized(idx), atol=1e-3, rtol=1e-3)
    assert jnp.allclose(out, reference_f32(idx), atol=2e-2, rtol=2e-2)

    # --- larger batch: still one invocation at these toy sizes ---
    big_batch = 256
    idx_big = jax.random.randint(kx2, (big_batch,), 0, one_hot_length,
                                 dtype=jnp.int32)
    out_big = jax.block_until_ready(cbow_forward(idx_big, w1_p, w2_p, b2_p))
    assert out_big.shape == (big_batch, one_hot_length)
    assert jnp.allclose(out_big, reference_quantized(idx_big),
                        atol=1e-3, rtol=1e-3)

    # --- vocab-tiled grid path (forced, to validate the large-problem path) ---
    out_tiled = jax.block_until_ready(
        cbow_forward(idx_big, w1_p, w2_p, b2_p, force_tiled=True,
                     block_b=128, vocab_tile=128))
    assert out_tiled.shape == (big_batch, one_hot_length)
    assert jnp.allclose(out_tiled, reference_quantized(idx_big),
                        atol=1e-3, rtol=1e-3)
    assert jnp.allclose(out_tiled, reference_f32(idx_big),
                        atol=2e-2, rtol=2e-2)

    print("KERNEL_OK")
</pallas_src>

<mosaic_0001>
module attributes {stable_mosaic.version = 11 : i64} {
  func.func @_cbow_small_kernel(%arg0: memref<8xi32, #tpu.memory_space<smem>>, %arg1: memref<256x128xf32, #tpu.memory_space<vmem>>, %arg2: memref<128x256xbf16, #tpu.memory_space<vmem>>, %arg3: memref<1x256xf32, #tpu.memory_space<vmem>>, %arg4: memref<8x256xf32, #tpu.memory_space<vmem>>, %arg5: memref<8x128xf32, #tpu.memory_space<vmem>>) attributes {dimension_semantics = [], scalar_prefetch = 0 : i64, scratch_operands = 1 : i64, tpu.core_type = #tpu.core_type<tc>} {
    %c0_i32 = arith.constant 0 : i32
    %c8_i32 = arith.constant 8 : i32
    %0 = arith.addi %c0_i32, %c8_i32 : i32
    %c1_i32 = arith.constant 1 : i32
    scf.for %arg6 = %c0_i32 to %0 step %c1_i32  : i32 {
      %c1_i32_8 = arith.constant 1 : i32
      %9 = arith.muli %arg6, %c1_i32_8 : i32
      %c0_i32_9 = arith.constant 0 : i32
      %10 = arith.addi %c0_i32_9, %9 : i32
      %c0_i32_10 = arith.constant 0 : i32
      %11 = arith.addi %c0_i32_10, %10 : i32
      %12 = arith.index_cast %11 : i32 to index
      %13 = memref.load %arg0[%12] : memref<8xi32, #tpu.memory_space<smem>>
      %14 = arith.index_cast %13 : i32 to index
      %c0_11 = arith.constant 0 : index
      %15 = vector.load %arg1[%14, %c0_11] : memref<256x128xf32, #tpu.memory_space<vmem>>, vector<1x128xf32>
      %16 = arith.index_cast %10 : i32 to index
      %c0_12 = arith.constant 0 : index
      %17 = vector.load %arg5[%16, %c0_12] : memref<8x128xf32, #tpu.memory_space<vmem>>, vector<1x128xf32>
      tpu.vector_store %arg5[%16, %c0_12], %15 {strides = array<i32>} : memref<8x128xf32, #tpu.memory_space<vmem>>, vector<1x128xf32>,
    }
    %c8_i32_0 = arith.constant 8 : i32
    %c0 = arith.constant 0 : index
    %c0_1 = arith.constant 0 : index
    %1 = vector.load %arg5[%c0, %c0_1] : memref<8x128xf32, #tpu.memory_space<vmem>>, vector<8x128xf32>
    %2 = arith.truncf %1 : vector<8x128xf32> to vector<8x128xbf16>
    %c0_2 = arith.constant 0 : index
    %c0_3 = arith.constant 0 : index
    %3 = vector.load %arg2[%c0_2, %c0_3] : memref<128x256xbf16, #tpu.memory_space<vmem>>, vector<128x256xbf16>
    %cst = arith.constant dense<0.000000e+00> : vector<8x256xf32>
    %4 = tpu.matmul %2, %3, %cst {dimension_numbers = #tpu.dot_dimension_numbers<[1], [0], [0], [1], [0, 0, 1, 1], [], []>} : vector<8x128xbf16>, vector<128x256xbf16>, vector<8x256xf32> -> vector<8x256xf32>
    %c0_4 = arith.constant 0 : index
    %c0_5 = arith.constant 0 : index
    %5 = vector.load %arg3[%c0_4, %c0_5] : memref<1x256xf32, #tpu.memory_space<vmem>>, vector<1x256xf32>
    %6 = vector.broadcast %5 : vector<1x256xf32> to vector<8x256xf32>
    %7 = arith.addf %4, %6 : vector<8x256xf32>
    %c0_6 = arith.constant 0 : index
    %c0_7 = arith.constant 0 : index
    %8 = vector.load %arg4[%c0_6, %c0_7] : memref<8x256xf32, #tpu.memory_space<vmem>>, vector<8x256xf32>
    tpu.vector_store %arg4[%c0_6, %c0_7], %7 {strides = array<i32>} : memref<8x256xf32, #tpu.memory_space<vmem>>, vector<8x256xf32>,
    return
  }
}

</mosaic_0001>

<bundles_post_ra>
// kernel: tpu_custom_call.1
= control target key start
LH: loop header
LB: loop body
LE: loop exit
PB: predicated region body
PF: predicated region fallthrough
CT: control target
= control target key end

     0   :  { %9 = vsyncpa [#allocation6], 0  ;;  %s476_s0 = inlined_call_operand.hbm [shape: s32[8], index: 0, kind: input, shape index: {}]   ;;  %s477_s1 = inlined_call_operand.hbm [shape: f32[256,128], index: 1, kind: input, shape index: {}]   ;;  %s478_s2 = inlined_call_operand.hbm [shape: bf16[128,256], index: 2, kind: input, shape index: {}]   ;;  %s479_s3 = inlined_call_operand.vmem [shape: f32[1,256], index: 3, kind: input, shape index: {}]   ;;  %s480_s4 = inlined_call_operand.hbm [shape: f32[8,256], index: 4, kind: output, shape index: {}]  }
   0x1   :  { %10 = vsyncpa [#allocation4], 0 }
   0x2   :  { %11 = vsyncpa [#allocation9], 0 }
   0x3   :  { %12 = vsyncpa [#allocation5], 0  ;;  %s301_s17 = scalar_lea.hbm %s476_s0, 16 }
   0x4   :  { %p302_p0 = scmp.ne.s32.totalorder %s476_s0, %s301_s17  ;;  %p305_p1 = scmp.lt.u32.totalorder %s301_s17, %s476_s0 }
   0x6   :  { %p307_p2 = pnand %p305_p1, %p302_p0 }
   0x8   :  { %310 = shalt.err (!%p307_p2)
}
   0x9   :  { %s393_s22 = smov [#allocation3]   ;;  %s394_s25 = smov [#allocation7]  }
   0xa   :  { %20 = dma.hbm_to_smem %s476_s0, 16, %s393_s22, [#allocation6]  }
   0xb   :  { %s26_s26 = sshll.u32 %s394_s25, 4  ;;  %s311_s29 = scalar_lea.hbm %s477_s1, 4096  ;;  %s27_s26 = int_to_ptr.vmem [resolvable:$true] %s26_s26 }
   0xc   :  { %p312_p3 = scmp.ne.s32.totalorder %s477_s1, %s311_s29  ;;  %p315_p4 = scmp.lt.u32.totalorder %s311_s29, %s477_s1 }
   0xe   :  { %p317_p5 = pnand %p315_p4, %p312_p3 }
  0x10   :  { %320 = shalt.err (!%p317_p5)
}
  0x11   :  { %s321_s8 = scalar_lea.vmem %s27_s26, 4096  ;;  %p326_p7 = scmp.lt.s32.totalorder %s27_s26, %s27_s26 }
  0x12   :  { %p322_p6 = scmp.ne.s32.totalorder %s27_s26, %s321_s8  ;;  %p327_p8 = scmp.lt.s32.totalorder %s321_s8, %s321_s8 }
  0x14   :  { %p328_p9 = por %p327_p8, %p326_p7 }
  0x16   :  { %p329_p10 = pnand %p328_p9, %p322_p6 }
  0x18   :  { %332 = shalt.err (!%p329_p10)
}
  0x19   :  { %s395_s0 = smov 128   ;;  %s396_s9 = smov 8  }
  0x1a   :  { %32 = dma.hbm_to_vmem [thread:$0]  %s477_s1, 4096, %s27_s26, [#allocation4], %s395_s0, %s395_s0, %s396_s9  }
  0x1b   :  { %s397_s12 = smov [#allocation8]   ;;  %s333_s16 = scalar_lea.hbm %s478_s2, 2048 }
  0x1c   :  { %s38_s13 = sshll.u32 %s397_s12, 4  ;;  %p334_p11 = scmp.ne.s32.totalorder %s478_s2, %s333_s16  ;;  %s39_s13 = int_to_ptr.vmem [resolvable:$true] %s38_s13 }
  0x1d   :  { %p337_p12 = scmp.lt.u32.totalorder %s333_s16, %s478_s2 }
  0x1f   :  { %p339_p13 = pnand %p337_p12, %p334_p11 }
  0x21   :  { %342 = shalt.err (!%p339_p13)
}
  0x22   :  { %s343_s21 = scalar_lea.vmem %s39_s13, 2048  ;;  %p348_p1 = scmp.lt.s32.totalorder %s39_s13, %s39_s13 }
  0x23   :  { %p344_p0 = scmp.ne.s32.totalorder %s39_s13, %s343_s21  ;;  %p349_p2 = scmp.lt.s32.totalorder %s343_s21, %s343_s21 }
  0x25   :  { %p350_p3 = por %p349_p2, %p348_p1 }
  0x27   :  { %p351_p4 = pnand %p350_p3, %p344_p0 }
  0x29   :  { %354 = shalt.err (!%p351_p4)
}
  0x2a   :  { %44 = dma.hbm_to_vmem [thread:$0]  %s478_s2, 2048, %s39_s13, [#allocation9], %s395_s0, %s395_s0, %s396_s9  }
  0x2b   :  { %381 = dma.done.wait [#allocation6], 16  }
  0x2c   :  { %382 = vsyncadd [#allocation6], 4294967280 }
  0x2d   :  { %383 = dma.done.wait [#allocation4], 4096  }
  0x2e   :  { %384 = vsyncadd [#allocation4], 4294963200 }
  0x2f   :  { %385 = dma.done.wait [#allocation9], 2048  }
  0x30   :  { %386 = vsyncadd [#allocation9], 4294965248 }
  0x31   :  { %56 = sfence }
  0x32   :  { %s389_s23 = smov 0  }
  0x33 LB: > { %s64_s24 = sld [smem:[#allocation3 + %s391_s23]]  ;;  %s67_s26 = scalar_lea.vmem [#allocation2], %s391_s23  ;;  %s391_s23 = sphi %s389_s23, %s63_s23  }
  0x34   : > { %s63_s23 = sadd.s32 1, %s391_s23  }
  0x35   : > { %p60_p5 = scmp.ge.s32.totalorder %s63_s23, 8  }
  0x36   :  { %v277_v1 = vld [vmem:[#allocation8 + $0x4] ss:$8 sps:$4 sm:$0xff] (%p60_p5)   ;;  %v279_v2 = vld [vmem:[#allocation8] ss:$8 sps:$4 sm:$0xff] (%p60_p5)   ;;  %v398_v3 = vmov (%p60_p5), 0   ;;  %v89_v20 = vlaneseq (%p60_p5)  ;;  %s399_s28 = smov (%p60_p5), [#allocation10]  }
  0x37   :  { %62 = sbr.rel (!%p60_p5) target bundleno = 51 (0x33), region = 57  ;;  %211 = vmatprep.mubr.bf16.mxu0 (%p60_p5), %v398_v3  ;;  %179 = vmatprep.subr.bf16.mxu0 (%p60_p5), %v277_v1  ;;  %v280_v4 = vld [vmem:[#allocation8 + $0x14] ss:$8 sps:$4 sm:$0xff] (%p60_p5)   ;;  %v282_v5 = vld [vmem:[#allocation8 + $0x10] ss:$8 sps:$4 sm:$0xff] (%p60_p5)   ;;  %s228_s29 = sshll.u32 (%p60_p5), %s399_s28, 4  ;;  %s229_s29 = int_to_ptr.vmem [resolvable:$true] %s228_s29 }
  0x38   :  { %180 = vmatpush1.bf16.msra.mxu0 (%p60_p5), %v279_v2  ;;  %v283_v6 = vld [vmem:[#allocation8 + $0x24] ss:$8 sps:$4 sm:$0xff] (%p60_p5)   ;;  %v285_v7 = vld [vmem:[#allocation8 + $0x20] ss:$8 sps:$4 sm:$0xff] (%p60_p5)   ;;  %v286_v8 = vld [vmem:[#allocation8 + $0x34] ss:$8 sps:$4 sm:$0xff] (%p60_p5)   ;;  %p360_p7 = scmp.lt.s32.totalorder (%p60_p5), %s229_s29, %s229_s29 }
  0x39   : > { %s65_s25 = scalar_lea.vmem [#allocation7], %s64_s24  ;;  %181 = vmatprep.subr.bf16.mxu0 (%p60_p5), %v280_v4  ;;  %v288_v9 = vld [vmem:[#allocation8 + $0x30] ss:$8 sps:$4 sm:$0xff] (%p60_p5)   ;;  %v289_v10 = vld [vmem:[#allocation8 + $0x44] ss:$8 sps:$4 sm:$0xff] (%p60_p5)   ;;  %v90_v21 = vshrl.u32 (%p60_p5), %v89_v20, 7 }
  0x3a   : > { %v66_v0 = vld [vmem:[%s65_s25] sm:$0x1]  ;;  %v291_v11 = vld [vmem:[#allocation8 + $0x40] ss:$8 sps:$4 sm:$0xff] (%p60_p5)   ;;  %v292_v12 = vld [vmem:[#allocation8 + $0x54] ss:$8 sps:$4 sm:$0xff] (%p60_p5)  }
  0x3b   : > { %68 = vst [vmem:[%s67_s26] sm:$0x1] %v66_v0  ;;  %v294_v13 = vld [vmem:[#allocation8 + $0x50] ss:$8 sps:$4 sm:$0xff] (%p60_p5)   ;;  %v295_v14 = vld [vmem:[#allocation8 + $0x64] ss:$8 sps:$4 sm:$0xff] (%p60_p5)   ;;  %v91_v22 = vsub.s32 (%p60_p5), 0, %v90_v21 }
  0x3c   :  { %182 = vmatpush1.bf16.msra.mxu0 (%p60_p5), %v282_v5  ;;  %v297_v15 = vld [vmem:[#allocation8 + $0x60] ss:$8 sps:$4 sm:$0xff] (%p60_p5)   ;;  %v298_v16 = vld [vmem:[#allocation8 + $0x74] ss:$8 sps:$4 sm:$0xff] (%p60_p5)   ;;  %v300_v17 = vld [vmem:[#allocation8 + $0x70] ss:$8 sps:$4 sm:$0xff] (%p60_p5)  }
  0x3d   :  { %183 = vmatprep.subr.bf16.mxu0 (%p60_p5), %v283_v6  ;;  %v87_v23 = vld [vmem:[%s479_s3] sm:$0x3] (%p60_p5)  ;;  %v95_v24 = vsub.s32 (%p60_p5), 1, %v90_v21  ;;  %s355_s30 = scalar_lea.vmem (%p60_p5), %s229_s29, 256 }
  0x3e   :  { %v92_v25 = vrot.slane %v87_v23, %v91_v22  ;;  %p356_p6 = scmp.ne.s32.totalorder %s229_s29, %s355_s30  ;;  %p361_p8 = scmp.lt.s32.totalorder %s355_s30, %s355_s30 }
  0x3f   :  { %v96_v26 = vrot.slane %v87_v23, %v95_v24 }
  0x40   :  { %184 = vmatpush1.bf16.msra.mxu0 %v285_v7  ;;  %p362_p9 = por %p361_p8, %p360_p7 }
  0x41   :  { %185 = vmatprep.subr.bf16.mxu0 %v286_v8 }
  0x42   :  { %v69_v18 = vld [vmem:[#allocation2] sm:$0xff]  ;;  %p363_p10 = pnand %p362_p9, %p356_p6 }
  0x43   :  { %v70_v19 = vpack.c.bf16 %v69_v18, %v69_v18 }
  0x44   :  { %186 = vmatpush1.bf16.msra.mxu0 %v288_v9 }
  0x45   :  { %187 = vmatprep.subr.bf16.mxu0 %v289_v10 }
  0x48   :  { %188 = vmatpush1.bf16.msra.mxu0 %v291_v11 }
  0x49   :  { %189 = vmatprep.subr.bf16.mxu0 %v292_v12 }
  0x4c   :  { %190 = vmatpush1.bf16.msra.mxu0 %v294_v13 }
  0x4d   :  { %191 = vmatprep.subr.bf16.mxu0 %v295_v14 }
  0x50   :  { %192 = vmatpush1.bf16.msra.mxu0 %v297_v15 }
  0x51   :  { %193 = vmatprep.subr.bf16.mxu0 %v298_v16 }
  0x54   :  { %194 = vmatpush1.bf16.msra.mxu0 %v300_v17 }
  0x57   :  { %212 = vmatmul.mubr.bf16.vlgmr.msra.gmra.mrb[0].mxu0 %v70_v19 }
 0x12a   :  { %v213_v27 = vpop.f32.mrb[0].mxu0 }
 0x12b   :  { %v214_v28 = vadd.f32 %v213_v27, %v92_v25  ;;  %v215_v29 = vpop.f32.mrb[1].mxu0 }
 0x12c   :  { %v216_v30 = vadd.f32 %v215_v29, %v96_v26  ;;  %v217_v31 = vpop.f32.mrb[2].mxu0 }
 0x12d   :  { %220 = vst [vmem:[#allocation10] sm:$0xff] %v214_v28  ;;  %v218_v32 = vpop.f32.mrb[3].mxu0 }
 0x12e   :  { %221 = vst [vmem:[#allocation10 + $0x8] sm:$0xff] %v216_v30 }
 0x12f   :  { %366 = shalt.err (!%p363_p10)
}
 0x130   :  { %s367_s6 = scalar_lea.hbm %s480_s4, 256 }
 0x131   :  { %p368_p11 = scmp.ne.s32.totalorder %s480_s4, %s367_s6  ;;  %p371_p12 = scmp.lt.u32.totalorder %s367_s6, %s480_s4 }
 0x133   :  { %p373_p13 = pnand %p371_p12, %p368_p11 }
 0x135   :  { %376 = shalt.err (!%p373_p13)
}
 0x136   :  { %231 = dma.vmem_to_hbm [thread:$0]  %s229_s29, 256, %s480_s4, [#allocation5]  }
 0x137   :  { %387 = dma.done.wait [#allocation5], 256  }
 0x138   :  { %388 = vsyncadd [#allocation5], 4294967040 }
 0x139   :  { %235 = vsyncpa [#allocation4], 1 }
 0x13a   :  { %236 = vsyncpa [#allocation9], 1 }
 0x13b   :  { %237 = vsyncpa [#allocation5], 1 }
 0x13c   :  { %238 = vsyncpa [#allocation6], 1 }

</bundles_post_ra>
